<compile_context>
chip_gen: v7x
topology: tpu7x:2x2x1
jax: 0.10.0
libtpu: 0.0.40
codegen_flags: <defaults>
</compile_context>

<pallas_src>
import functools

import jax
import jax.numpy as jnp
import numpy as np
from jax.experimental import pallas as pl
from jax.experimental.pallas import tpu as pltpu


# ---------------------------------------------------------------------------
# Kernels
# ---------------------------------------------------------------------------

def _rsoftmax_kernel(x_ref, o_ref, *, radix, cardinality, inner):
    """Softmax over radix, fused with the (card, radix)->(radix, card) swizzle.

    x_ref : (TB, C) block in the natural fc2 layout   (c-major, then radix)
    o_ref : (TB, C) block in PyTorch's flattened post-transpose layout
            (radix-major, then cardinality).
    All slice offsets are compile-time constants -> plain contiguous lane
    slices of a lane-dense (TB, C) ref, no masked sublane games.
    """
    for c in range(cardinality):
        in_base = c * radix * inner          # start of group c in the input
        # group c / radix r lives at out offset (r * cardinality + c) * inner

        def load(r, _base=in_base):
            return x_ref[:, pl.ds(_base + r * inner, inner)].astype(jnp.float32)

        def store(r, val, _c=c):
            o_ref[:, pl.ds((r * cardinality + _c) * inner, inner)] = (
                val.astype(o_ref.dtype))

        if radix == 2:
            # softmax over two logits == sigmoid of their difference (exact).
            d = load(0) - load(1)
            store(0, jax.nn.sigmoid(d))
            store(1, jax.nn.sigmoid(-d))
            continue

        # General radix: streaming 3-pass softmax.  Only `m` and `s` stay live
        # (each (TB, inner) f32); x slices are re-read from VMEM, exp rides the
        # otherwise-idle EUP slot in this memory-bound kernel.
        m = load(0)
        for r in range(1, radix):
            m = jnp.maximum(m, load(r))
        s = jnp.exp(load(0) - m)
        for r in range(1, radix):
            s = s + jnp.exp(load(r) - m)
        inv = 1.0 / s                         # exact reciprocal (not approx)
        for r in range(radix):
            store(r, jnp.exp(load(r) - m) * inv)


def _sigmoid_kernel(x_ref, o_ref):
    # Single EUP logistic op per element.  f32 math is correct on all
    # generations (v5e has no native bf16 VPU/EUP anyway).
    o_ref[...] = jax.nn.sigmoid(x_ref[...].astype(jnp.float32)).astype(o_ref.dtype)


# ---------------------------------------------------------------------------
# Wrapper
# ---------------------------------------------------------------------------

# Per-grid-step working-set budget.  Accounts for double-buffered (in + out)
# plus f32 intermediate headroom; with a 32 MiB scoped-VMEM limit this is safe
# on v5e / v6e (128 MiB physical) and v7x (64 MiB physical).
_VMEM_BUDGET_BYTES = 16 * 1024 * 1024
_VMEM_LIMIT_BYTES = 32 * 1024 * 1024


def _pick_batch_tile(batch, feat, itemsize):
    """Rows per grid step, sized against the full per-step working set."""
    # 2 x double-buffered (in + out) = 4*itemsize per element, plus ~8 B/elem
    # of f32 intermediate headroom inside the kernel body.
    per_row_bytes = max(1, feat * (4 * itemsize + 8))
    rows = _VMEM_BUDGET_BYTES // per_row_bytes
    if rows >= batch:
        return batch                           # one (or few) big block(s)
    # Tiled along batch: second-to-last block dim must be a multiple of 8.
    return min(batch, max(8, (rows // 8) * 8))


def rsoftmax_forward(x, radix, cardinality):
    """x: (B, C, 1, 1) NCHW tensor (as produced by fc2 in SplAtConv2d)."""
    batch = x.shape[0]
    feat = int(np.prod(x.shape[1:]))
    x2 = x.reshape(batch, feat)                # free reshape, layout unchanged

    tb = _pick_batch_tile(batch, feat, x.dtype.itemsize)
    grid = (pl.cdiv(batch, tb),)

    if radix > 1:
        assert feat % (radix * cardinality) == 0, (
            "feature dim must be divisible by radix * cardinality")
        inner = feat // (radix * cardinality)
        kernel = functools.partial(
            _rsoftmax_kernel, radix=radix, cardinality=cardinality, inner=inner)
    else:
        kernel = _sigmoid_kernel

    out = pl.pallas_call(
        kernel,
        out_shape=jax.ShapeDtypeStruct((batch, feat), x.dtype),
        grid_spec=pltpu.PrefetchScalarGridSpec(
            num_scalar_prefetch=0,
            grid=grid,
            # Trailing block dim == full channel dim -> lane-dense & tiling-legal.
            in_specs=[pl.BlockSpec((tb, feat), lambda b: (b, 0))],
            out_specs=pl.BlockSpec((tb, feat), lambda b: (b, 0)),
        ),
        compiler_params=pltpu.CompilerParams(
            dimension_semantics=("parallel",),
            vmem_limit_bytes=_VMEM_LIMIT_BYTES,
        ),
    )(x2)

    if radix > 1:
        # Output block layout already matches PyTorch's transpose + reshape(B,-1).
        return out
    return out.reshape(x.shape)                # sigmoid preserves shape


# ---------------------------------------------------------------------------
# Pure-JAX reference
# ---------------------------------------------------------------------------

def _reference(x, radix, cardinality):
    batch = x.shape[0]
    if radix > 1:
        feat = int(np.prod(x.shape[1:]))
        inner = feat // (cardinality * radix)
        xr = x.reshape(batch, cardinality, radix, inner)
        xr = jnp.transpose(xr, (0, 2, 1, 3))
        xr = jax.nn.softmax(xr.astype(jnp.float32), axis=1)
        return xr.reshape(batch, -1).astype(x.dtype)
    return jax.nn.sigmoid(x.astype(jnp.float32)).astype(x.dtype)


if __name__ == "__main__":
    key = jax.random.PRNGKey(0)

    # --- radix=2, cardinality=4 (radix>1 fast path, swizzle exercised) -------
    radix, card = 2, 4
    batch, C = 2, 16                           # inner = 16 / (2*4) = 2
    k0, k1, k2, k3 = jax.random.split(key, 4)
    x = jax.random.normal(k0, (batch, C, 1, 1), dtype=jnp.float32)
    out = jax.block_until_ready(rsoftmax_forward(x, radix, card))
    ref = _reference(x, radix, card)
    assert out.shape == (batch, C)
    np.testing.assert_allclose(np.asarray(out), np.asarray(ref),
                               rtol=1e-5, atol=1e-6)

    # --- radix=2, cardinality=1 (standard ResNeSt config, contiguous path) ---
    xs = jax.random.normal(k1, (2, 32, 1, 1), dtype=jnp.float32)  # inner = 16
    outs = jax.block_until_ready(rsoftmax_forward(xs, 2, 1))
    refs = _reference(xs, 2, 1)
    assert outs.shape == (2, 32)
    np.testing.assert_allclose(np.asarray(outs), np.asarray(refs),
                               rtol=1e-5, atol=1e-6)

    # --- general radix path (radix=4, cardinality=2) --------------------------
    radix4, card4 = 4, 2
    batch4, C4 = 4, 32                         # inner = 32 / (4*2) = 4
    x4 = jax.random.normal(k2, (batch4, C4, 1, 1), dtype=jnp.float32)
    out4 = jax.block_until_ready(rsoftmax_forward(x4, radix4, card4))
    ref4 = _reference(x4, radix4, card4)
    assert out4.shape == (batch4, C4)
    # Exact reciprocal now -> tight tolerance vs PyTorch/JAX softmax.
    np.testing.assert_allclose(np.asarray(out4), np.asarray(ref4),
                               rtol=1e-5, atol=1e-6)

    # --- radix == 1 path (sigmoid) --------------------------------------------
    x1 = jax.random.normal(k3, (batch, C, 1, 1), dtype=jnp.float32)
    out1 = jax.block_until_ready(rsoftmax_forward(x1, 1, card))
    ref1 = _reference(x1, 1, card)
    assert out1.shape == x1.shape
    np.testing.assert_allclose(np.asarray(out1), np.asarray(ref1),
                               rtol=1e-5, atol=1e-6)

    print("KERNEL_OK")
</pallas_src>

<mosaic_0001>
module attributes {stable_mosaic.version = 11 : i64} {
  func.func @_rsoftmax_kernel(%arg0: i32, %arg1: memref<2x16xf32, #tpu.memory_space<vmem>>, %arg2: memref<2x16xf32, #tpu.memory_space<vmem>>) attributes {dimension_semantics = [#tpu.dimension_semantics<parallel>], iteration_bounds = array<i64: 1>, scalar_prefetch = 0 : i64, scratch_operands = 0 : i64, tpu.core_type = #tpu.core_type<tc>, window_params = [{transform_indices = @transform_0, window_bounds = array<i64: 2, 16>}, {transform_indices = @transform_1, window_bounds = array<i64: 2, 16>}]} {
    %c0 = arith.constant 0 : index
    %c0_0 = arith.constant 0 : index
    %0 = vector.load %arg1[%c0, %c0_0] : memref<2x16xf32, #tpu.memory_space<vmem>>, vector<2x2xf32>
    %c0_1 = arith.constant 0 : index
    %c2 = arith.constant 2 : index
    %1 = vector.load %arg1[%c0_1, %c2] : memref<2x16xf32, #tpu.memory_space<vmem>>, vector<2x2xf32>
    %2 = arith.subf %0, %1 : vector<2x2xf32>
    %3 = arith.negf %2 : vector<2x2xf32>
    %4 = math.exp %3 : vector<2x2xf32>
    %cst = arith.constant 1.000000e+00 : f32
    %5 = vector.broadcast %cst : f32 to vector<2x2xf32>
    %6 = arith.addf %5, %4 : vector<2x2xf32>
    %7 = arith.divf %5, %6 : vector<2x2xf32>
    %c0_2 = arith.constant 0 : index
    %c0_3 = arith.constant 0 : index
    %8 = vector.load %arg2[%c0_2, %c0_3] : memref<2x16xf32, #tpu.memory_space<vmem>>, vector<2x2xf32>
    tpu.vector_store %arg2[%c0_2, %c0_3], %7 {strides = array<i32>} : memref<2x16xf32, #tpu.memory_space<vmem>>, vector<2x2xf32>,
    %cst_4 = arith.constant 0.000000e+00 : f32
    %9 = vector.broadcast %cst_4 : f32 to vector<2x2xf32>
    %10 = arith.subf %9, %2 : vector<2x2xf32>
    %11 = arith.negf %10 : vector<2x2xf32>
    %12 = math.exp %11 : vector<2x2xf32>
    %cst_5 = arith.constant 1.000000e+00 : f32
    %13 = vector.broadcast %cst_5 : f32 to vector<2x2xf32>
    %14 = arith.addf %13, %12 : vector<2x2xf32>
    %15 = arith.divf %13, %14 : vector<2x2xf32>
    %c0_6 = arith.constant 0 : index
    %c8 = arith.constant 8 : index
    %16 = vector.load %arg2[%c0_6, %c8] : memref<2x16xf32, #tpu.memory_space<vmem>>, vector<2x2xf32>
    tpu.vector_store %arg2[%c0_6, %c8], %15 {strides = array<i32>} : memref<2x16xf32, #tpu.memory_space<vmem>>, vector<2x2xf32>,
    %c0_7 = arith.constant 0 : index
    %c4 = arith.constant 4 : index
    %17 = vector.load %arg1[%c0_7, %c4] : memref<2x16xf32, #tpu.memory_space<vmem>>, vector<2x2xf32>
    %c0_8 = arith.constant 0 : index
    %c6 = arith.constant 6 : index
    %18 = vector.load %arg1[%c0_8, %c6] : memref<2x16xf32, #tpu.memory_space<vmem>>, vector<2x2xf32>
    %19 = arith.subf %17, %18 : vector<2x2xf32>
    %20 = arith.negf %19 : vector<2x2xf32>
    %21 = math.exp %20 : vector<2x2xf32>
    %cst_9 = arith.constant 1.000000e+00 : f32
    %22 = vector.broadcast %cst_9 : f32 to vector<2x2xf32>
    %23 = arith.addf %22, %21 : vector<2x2xf32>
    %24 = arith.divf %22, %23 : vector<2x2xf32>
    %c0_10 = arith.constant 0 : index
    %c2_11 = arith.constant 2 : index
    %25 = vector.load %arg2[%c0_10, %c2_11] : memref<2x16xf32, #tpu.memory_space<vmem>>, vector<2x2xf32>
    tpu.vector_store %arg2[%c0_10, %c2_11], %24 {strides = array<i32>} : memref<2x16xf32, #tpu.memory_space<vmem>>, vector<2x2xf32>,
    %cst_12 = arith.constant 0.000000e+00 : f32
    %26 = vector.broadcast %cst_12 : f32 to vector<2x2xf32>
    %27 = arith.subf %26, %19 : vector<2x2xf32>
    %28 = arith.negf %27 : vector<2x2xf32>
    %29 = math.exp %28 : vector<2x2xf32>
    %cst_13 = arith.constant 1.000000e+00 : f32
    %30 = vector.broadcast %cst_13 : f32 to vector<2x2xf32>
    %31 = arith.addf %30, %29 : vector<2x2xf32>
    %32 = arith.divf %30, %31 : vector<2x2xf32>
    %c0_14 = arith.constant 0 : index
    %c10 = arith.constant 10 : index
    %33 = vector.load %arg2[%c0_14, %c10] : memref<2x16xf32, #tpu.memory_space<vmem>>, vector<2x2xf32>
    tpu.vector_store %arg2[%c0_14, %c10], %32 {strides = array<i32>} : memref<2x16xf32, #tpu.memory_space<vmem>>, vector<2x2xf32>,
    %c0_15 = arith.constant 0 : index
    %c8_16 = arith.constant 8 : index
    %34 = vector.load %arg1[%c0_15, %c8_16] : memref<2x16xf32, #tpu.memory_space<vmem>>, vector<2x2xf32>
    %c0_17 = arith.constant 0 : index
    %c10_18 = arith.constant 10 : index
    %35 = vector.load %arg1[%c0_17, %c10_18] : memref<2x16xf32, #tpu.memory_space<vmem>>, vector<2x2xf32>
    %36 = arith.subf %34, %35 : vector<2x2xf32>
    %37 = arith.negf %36 : vector<2x2xf32>
    %38 = math.exp %37 : vector<2x2xf32>
    %cst_19 = arith.constant 1.000000e+00 : f32
    %39 = vector.broadcast %cst_19 : f32 to vector<2x2xf32>
    %40 = arith.addf %39, %38 : vector<2x2xf32>
    %41 = arith.divf %39, %40 : vector<2x2xf32>
    %c0_20 = arith.constant 0 : index
    %c4_21 = arith.constant 4 : index
    %42 = vector.load %arg2[%c0_20, %c4_21] : memref<2x16xf32, #tpu.memory_space<vmem>>, vector<2x2xf32>
    tpu.vector_store %arg2[%c0_20, %c4_21], %41 {strides = array<i32>} : memref<2x16xf32, #tpu.memory_space<vmem>>, vector<2x2xf32>,
    %cst_22 = arith.constant 0.000000e+00 : f32
    %43 = vector.broadcast %cst_22 : f32 to vector<2x2xf32>
    %44 = arith.subf %43, %36 : vector<2x2xf32>
    %45 = arith.negf %44 : vector<2x2xf32>
    %46 = math.exp %45 : vector<2x2xf32>
    %cst_23 = arith.constant 1.000000e+00 : f32
    %47 = vector.broadcast %cst_23 : f32 to vector<2x2xf32>
    %48 = arith.addf %47, %46 : vector<2x2xf32>
    %49 = arith.divf %47, %48 : vector<2x2xf32>
    %c0_24 = arith.constant 0 : index
    %c12 = arith.constant 12 : index
    %50 = vector.load %arg2[%c0_24, %c12] : memref<2x16xf32, #tpu.memory_space<vmem>>, vector<2x2xf32>
    tpu.vector_store %arg2[%c0_24, %c12], %49 {strides = array<i32>} : memref<2x16xf32, #tpu.memory_space<vmem>>, vector<2x2xf32>,
    %c0_25 = arith.constant 0 : index
    %c12_26 = arith.constant 12 : index
    %51 = vector.load %arg1[%c0_25, %c12_26] : memref<2x16xf32, #tpu.memory_space<vmem>>, vector<2x2xf32>
    %c0_27 = arith.constant 0 : index
    %c14 = arith.constant 14 : index
    %52 = vector.load %arg1[%c0_27, %c14] : memref<2x16xf32, #tpu.memory_space<vmem>>, vector<2x2xf32>
    %53 = arith.subf %51, %52 : vector<2x2xf32>
    %54 = arith.negf %53 : vector<2x2xf32>
    %55 = math.exp %54 : vector<2x2xf32>
    %cst_28 = arith.constant 1.000000e+00 : f32
    %56 = vector.broadcast %cst_28 : f32 to vector<2x2xf32>
    %57 = arith.addf %56, %55 : vector<2x2xf32>
    %58 = arith.divf %56, %57 : vector<2x2xf32>
    %c0_29 = arith.constant 0 : index
    %c6_30 = arith.constant 6 : index
    %59 = vector.load %arg2[%c0_29, %c6_30] : memref<2x16xf32, #tpu.memory_space<vmem>>, vector<2x2xf32>
    tpu.vector_store %arg2[%c0_29, %c6_30], %58 {strides = array<i32>} : memref<2x16xf32, #tpu.memory_space<vmem>>, vector<2x2xf32>,
    %cst_31 = arith.constant 0.000000e+00 : f32
    %60 = vector.broadcast %cst_31 : f32 to vector<2x2xf32>
    %61 = arith.subf %60, %53 : vector<2x2xf32>
    %62 = arith.negf %61 : vector<2x2xf32>
    %63 = math.exp %62 : vector<2x2xf32>
    %cst_32 = arith.constant 1.000000e+00 : f32
    %64 = vector.broadcast %cst_32 : f32 to vector<2x2xf32>
    %65 = arith.addf %64, %63 : vector<2x2xf32>
    %66 = arith.divf %64, %65 : vector<2x2xf32>
    %c0_33 = arith.constant 0 : index
    %c14_34 = arith.constant 14 : index
    %67 = vector.load %arg2[%c0_33, %c14_34] : memref<2x16xf32, #tpu.memory_space<vmem>>, vector<2x2xf32>
    tpu.vector_store %arg2[%c0_33, %c14_34], %66 {strides = array<i32>} : memref<2x16xf32, #tpu.memory_space<vmem>>, vector<2x2xf32>,
    return
  }
  func.func @transform_0(%arg0: i32) -> (i32, i32) {
    %c0_i32 = arith.constant 0 : i32
    %c0_i32_0 = arith.constant 0 : i32
    return %arg0, %c0_i32 : i32, i32
  }
  func.func @transform_1(%arg0: i32) -> (i32, i32) {
    %c0_i32 = arith.constant 0 : i32
    %c0_i32_0 = arith.constant 0 : i32
    return %arg0, %c0_i32 : i32, i32
  }
}

</mosaic_0001>

<bundles_post_ra>
// kernel: tpu_custom_call.1
= control target key start
LH: loop header
LB: loop body
LE: loop exit
PB: predicated region body
PF: predicated region fallthrough
CT: control target
= control target key end

     0   :  { %6 = vsyncpa [#allocation3], 0  ;;  %s301_s0 = inlined_call_operand.hbm [shape: f32[2,16], index: 0, kind: input, shape index: {}]   ;;  %s302_s1 = inlined_call_operand.hbm [shape: f32[2,16], index: 1, kind: output, shape index: {}]  }
   0x1   :  { %7 = vsyncpa [#allocation4], 0  ;;  %s253_s6 = smov [#allocation2]   ;;  %s205_s10 = scalar_lea.hbm %s301_s0, 32 }
   0x2   :  { %s14_s7 = sshll.u32 %s253_s6, 4  ;;  %p206_p0 = scmp.ne.s32.totalorder %s301_s0, %s205_s10  ;;  %s15_s7 = int_to_ptr.vmem [resolvable:$true] %s14_s7 }
   0x3   :  { %p209_p1 = scmp.lt.u32.totalorder %s205_s10, %s301_s0 }
   0x5   :  { %p211_p2 = pnand %p209_p1, %p206_p0 }
   0x7   :  { %214 = shalt.err (!%p211_p2)
}
   0x8   :  { %s215_s15 = scalar_lea.vmem %s15_s7, 32  ;;  %p220_p4 = scmp.lt.s32.totalorder %s15_s7, %s15_s7 }
   0x9   :  { %p216_p3 = scmp.ne.s32.totalorder %s15_s7, %s215_s15  ;;  %p221_p5 = scmp.lt.s32.totalorder %s215_s15, %s215_s15 }
   0xb   :  { %p222_p6 = por %p221_p5, %p220_p4 }
   0xd   :  { %p223_p7 = pnand %p222_p6, %p216_p3 }
   0xf   :  { %226 = shalt.err (!%p223_p7)
}
  0x10   :  { %17 = dma.hbm_to_vmem [thread:$0]  %s301_s0, 32, %s15_s7, [#allocation3]  }
  0x11   :  { %249 = dma.done.wait [#allocation3], 32  }
  0x12   :  { %250 = vsyncadd [#allocation3], 4294967264  ;;  %v21_v0 = vld [vmem:[#allocation2] sm:$0x3]  ;;  %s254_s18 = smov 126   ;;  %vm33_vm0 = vcmask 9216  }
  0x13   :  { %v79_v1 = vld [vmem:[#allocation2] sm:$0x3]  ;;  %23 = vrot.lane.b32.xlu0 %v21_v0, %s254_s18  ;;  %s255_s0 = smov 8   ;;  %s256_s19 = smov 6   ;;  %vm46_vm1 = vcmask 74816   ;;  %vm64_vm2 = vcmask 25616  }
  0x14   :  { %81 = vrot.lane.b32.xlu1 %v79_v1, %s254_s18  ;;  %v48_v2 = vld [vmem:[#allocation2] sm:$0x3]  ;;  %s257_s20 = smov 124   ;;  %s258_s21 = smov 4   ;;  %vm77_vm3 = vcmask 91216   ;;  %vm95_vm4 = vcmask 42016  }
  0x15   :  { %v110_v3 = vld [vmem:[#allocation2] sm:$0x3]  ;;  %s259_s22 = smov 122   ;;  %s260_s23 = smov 2   ;;  %vm108_vm5 = vcmask 107616   ;;  %vm126_vm6 = vcmask 58416  }
  0x16   :  { %s261_s24 = smov [#allocation5]   ;;  %vm139_vm7 = vcmask 124016  }
  0x17   :  { %50 = vrot.lane.b32.xlu0 %v48_v2, %s254_s18  ;;  %s147_s25 = sshll.u32 %s261_s24, 4  ;;  %s148_s25 = int_to_ptr.vmem [resolvable:$true] %s147_s25 }
  0x18   :  { %112 = vrot.lane.b32.xlu1 %v110_v3, %s254_s18  ;;  %s227_s26 = scalar_lea.vmem %s148_s25, 32  ;;  %p232_p9 = scmp.lt.s32.totalorder %s148_s25, %s148_s25 }
  0x19   :  { %p228_p8 = scmp.ne.s32.totalorder %s148_s25, %s227_s26  ;;  %p233_p10 = scmp.lt.s32.totalorder %s227_s26, %s227_s26 }
  0x1b   :  { %p234_p11 = por %p233_p10, %p232_p9 }
  0x1d   :  { %p235_p12 = pnand %p234_p11, %p228_p8 }
  0x85   :  { %v24_v4 = vpop.permute.xlu0 %23 }
  0x86   :  { %v82_v5 = vpop.permute.xlu1 %81  ;;  %v26_v6 = vsub.f32 %v21_v0, %v24_v4 }
  0x87   :  { %v84_v7 = vsub.f32 %v79_v1, %v82_v5 }
  0x88   :  { %v156_v8 = vmul.f32 -1.442695, %v26_v6  ;;  %v35_v9 = vsub.f32 0.0, %v26_v6 }
  0x89   :  { %v160_v10 = vmul.f32 -1.442695, %v84_v7  ;;  %v97_v11 = vsub.f32 0.0, %v84_v7  ;;  %v51_v12 = vpop.permute.xlu0 %50 }
  0x8a   :  { %v113_v13 = vpop.permute.xlu1 %112  ;;  %173 = vpow2.f32 %v156_v8  ;;  %v157_v14 = vmul.f32 -1.442695, %v35_v9  ;;  %v53_v15 = vsub.f32 %v48_v2, %v51_v12 }
  0x8b   :  { %v161_v16 = vmul.f32 -1.442695, %v97_v11  ;;  %175 = vpow2.f32 %v160_v10  ;;  %v115_v17 = vsub.f32 %v110_v3, %v113_v13 }
  0x8c   :  { %177 = vpow2.f32 %v157_v14  ;;  %v158_v18 = vmul.f32 -1.442695, %v53_v15  ;;  %v66_v19 = vsub.f32 0.0, %v53_v15 }
  0x8d   :  { %179 = vpow2.f32 %v161_v16  ;;  %v162_v20 = vmul.f32 -1.442695, %v115_v17  ;;  %v128_v21 = vsub.f32 0.0, %v115_v17 }
  0x8e   :  { %181 = vpow2.f32 %v158_v18  ;;  %v159_v22 = vmul.f32 -1.442695, %v66_v19 }
  0x8f   :  { %183 = vpow2.f32 %v162_v20  ;;  %v163_v23 = vmul.f32 -1.442695, %v128_v21 }
  0x90   :  { %185 = vpow2.f32 %v159_v22 }
  0x91   :  { %187 = vpow2.f32 %v163_v23 }
  0x94   :  { %v174_v24 = vpop.eup %173 }
  0x95   :  { %v176_v25 = vpop.eup %175  ;;  %v30_v26 = vadd.f32 1.0, %v174_v24 }
  0x96   :  { %v178_v27 = vpop.eup %177  ;;  %v88_v31 = vadd.f32 1.0, %v176_v25 }
  0x97   :  { %v180_v28 = vpop.eup %179  ;;  %189 = vrcp.f32 %v30_v26  ;;  %v39_v29 = vadd.f32 1.0, %v178_v27 }
  0x98   :  { %v182_v30 = vpop.eup %181  ;;  %v101_v36 = vadd.f32 1.0, %v180_v28 }
  0x99   :  { %v184_v32 = vpop.eup %183  ;;  %191 = vrcp.f32 %v39_v29  ;;  %v57_v33 = vadd.f32 1.0, %v182_v30 }
  0x9a   :  { %v186_v34 = vpop.eup %185  ;;  %v119_v38 = vadd.f32 1.0, %v184_v32 }
  0x9b   :  { %193 = vrcp.f32 %v57_v33  ;;  %v70_v35 = vadd.f32 1.0, %v186_v34  ;;  %v188_v37 = vpop.eup %187 }
  0x9c   :  { %195 = vrcp.f32 %v88_v31  ;;  %v132_v39 = vadd.f32 1.0, %v188_v37 }
  0x9d   :  { %197 = vrcp.f32 %v70_v35 }
  0x9e   :  { %199 = vrcp.f32 %v101_v36 }
  0x9f   :  { %201 = vrcp.f32 %v119_v38 }
  0xa0   :  { %203 = vrcp.f32 %v132_v39 }
  0xa1   :  { %v190_v40 = vpop.eup %189 }
  0xa2   :  { %34 = vst.msk [vmem:[#allocation5] sm:$0x3] %vm33_vm0, %v190_v40 }
  0xa3   :  { %v192_v41 = vpop.eup %191 }
  0xa4   :  { %43 = vrot.lane.b32.xlu0 %v192_v41, %s255_s0 }
  0xa5   :  { %v194_v42 = vpop.eup %193 }
  0xa6   :  { %v196_v43 = vpop.eup %195  ;;  %61 = vrot.lane.b32.xlu1 %v194_v42, %s254_s18 }
  0xa7   :  { %v198_v44 = vpop.eup %197 }
  0xa8   :  { %74 = vrot.lane.b32.xlu0 %v198_v44, %s256_s19  ;;  %v200_v45 = vpop.eup %199 }
  0xa9   :  { %v202_v46 = vpop.eup %201 }
  0xaa   :  { %92 = vrot.lane.b32.xlu1 %v196_v43, %s257_s20  ;;  %v204_v47 = vpop.eup %203 }
  0xac   :  { %105 = vrot.lane.b32.xlu0 %v200_v45, %s258_s21 }
  0xae   :  { %123 = vrot.lane.b32.xlu1 %v202_v46, %s259_s22 }
  0xb0   :  { %136 = vrot.lane.b32.xlu0 %v204_v47, %s260_s23 }
 0x116   :  { %v44_v48 = vpop.permute.xlu0 %43 }
 0x117   :  { %47 = vst.msk [vmem:[#allocation5] sm:$0x3] %vm46_vm1, %v44_v48 }
 0x118   :  { %v62_v49 = vpop.permute.xlu1 %61 }
 0x119   :  { %65 = vst.msk [vmem:[#allocation5] sm:$0x3] %vm64_vm2, %v62_v49 }
 0x11a   :  { %v75_v50 = vpop.permute.xlu0 %74 }
 0x11b   :  { %78 = vst.msk [vmem:[#allocation5] sm:$0x3] %vm77_vm3, %v75_v50 }
 0x11c   :  { %v93_v51 = vpop.permute.xlu1 %92 }
 0x11d   :  { %96 = vst.msk [vmem:[#allocation5] sm:$0x3] %vm95_vm4, %v93_v51 }
 0x11e   :  { %v106_v52 = vpop.permute.xlu0 %105 }
 0x11f   :  { %109 = vst.msk [vmem:[#allocation5] sm:$0x3] %vm108_vm5, %v106_v52 }
 0x120   :  { %v124_v53 = vpop.permute.xlu1 %123 }
 0x121   :  { %127 = vst.msk [vmem:[#allocation5] sm:$0x3] %vm126_vm6, %v124_v53 }
 0x122   :  { %v137_v54 = vpop.permute.xlu0 %136 }
 0x123   :  { %140 = vst.msk [vmem:[#allocation5] sm:$0x3] %vm139_vm7, %v137_v54 }
 0x124   :  { %238 = shalt.err (!%p235_p12)
}
 0x125   :  { %s239_s29 = scalar_lea.hbm %s302_s1, 32 }
 0x126   :  { %p240_p13 = scmp.ne.s32.totalorder %s302_s1, %s239_s29  ;;  %p243_p0 = scmp.lt.u32.totalorder %s239_s29, %s302_s1 }
 0x128   :  { %p245_p1 = pnand %p243_p0, %p240_p13 }
 0x12a   :  { %248 = shalt.err (!%p245_p1)
}
 0x12b   :  { %150 = dma.vmem_to_hbm [thread:$0]  %s148_s25, 32, %s302_s1, [#allocation4]  }
 0x12c   :  { %251 = dma.done.wait [#allocation4], 32  }
 0x12d   :  { %252 = vsyncadd [#allocation4], 4294967264 }
 0x12e   :  { %154 = vsyncpa [#allocation3], 1 }
 0x12f   :  { %155 = vsyncpa [#allocation4], 1 }

</bundles_post_ra>
